<compile_context>
chip_gen: v5e
topology: v5e:2x2
jax: 0.10.0
libtpu: 0.0.40
codegen_flags: <defaults>
</compile_context>

<pallas_src>
import jax
import jax.numpy as jnp
from jax.experimental import pallas as pl
from jax.experimental.pallas import tpu as pltpu


# ----------------------------------------------------------------------------
# Pallas kernel: fused encoder (Linear+ReLU, Linear+ReLU) -> decoder (Linear)
# on row-packed, block-diagonal weights.
# ----------------------------------------------------------------------------
def _encode_decode_kernel(x_ref, w1_ref, b1_ref, w2_ref, b2_ref,
                          w3_ref, b3_ref, o_ref):
    x = x_ref[...]                                    # (tile_m, P*F), bf16
    # layer 1: gather already folded into w1; bf16 x bf16 MXU, f32 accumulate.
    h = jnp.dot(x, w1_ref[...], preferred_element_type=jnp.float32) + b1_ref[...]
    h = jnp.maximum(h, 0.0)
    # layer 2: cast activations to the MXU-native dtype, accumulate in f32.
    h = jnp.dot(h.astype(w2_ref.dtype), w2_ref[...],
                preferred_element_type=jnp.float32) + b2_ref[...]
    h = jnp.maximum(h, 0.0)
    # decoder
    o = jnp.dot(h.astype(w3_ref.dtype), w3_ref[...],
                preferred_element_type=jnp.float32) + b3_ref[...]
    o_ref[...] = o.astype(o_ref.dtype)


# ----------------------------------------------------------------------------
# Small host-side helpers (run once, at factory time)
# ----------------------------------------------------------------------------
def _round_up(x, m):
    return ((x + m - 1) // m) * m


def _pack_factor(f):
    """Rows packed per lane-dense row.  P*F == 128 when F divides 128;
    otherwise fall back to the unpacked layout (still correct, just less
    lane-dense)."""
    if 0 < f <= 128 and 128 % f == 0:
        return 128 // f
    return 1


def _block_diag(w, p):
    """(a, b) -> (p*a, p*b) block-diagonal replication of w."""
    a, b = w.shape
    eye = jnp.eye(p, dtype=w.dtype)
    return (eye[:, None, :, None] * w[None, :, None, :]).reshape(p * a, p * b)


def _vmem_budget_bytes():
    """Budget for the double-buffered (input+output) row tiles.  Stays under
    every generation's *default* scoped VMEM limit (16 MiB v5e, 32 MiB
    v6e/v7x) so no vmem_limit_bytes override is needed, and scales down with
    physical VMEM (v7x cores have 64 MiB vs 128 MiB on v5e/v6e)."""
    try:
        phys = int(pltpu.get_tpu_info().vmem_capacity_bytes)
    except Exception:
        phys = 64 << 20                      # conservative (v7x) assumption
    return min(phys // 4, 12 << 20)


def _choose_tile_m(n_rows, bytes_per_row, max_tile_m, vmem_budget):
    """Pick the packed-row tile.

    * Small problem (<~1 MiB total): one grid step.  The grid is a serial
      loop on single-TC v5e/v6e, so splitting only adds per-step overhead.
    * Otherwise: ~2 MiB of in+out traffic per step (amortizes the ~0.35 us
      per-step overhead), at least 256 rows, and aim for >=4 grid steps so
      each v7x TensorCore gets a >=2-step pipeline (prefetch/writeback
      overlap per core).  Cap so 2x(in+out) tiles fit the VMEM budget.
    """
    small_one_shot = 1 << 20
    target_step_bytes = 2 << 20
    if n_rows * bytes_per_row <= small_one_shot and n_rows <= max_tile_m:
        return n_rows                        # block == full dim
    tile = max(256, target_step_bytes // bytes_per_row)
    tile = min(tile, max(256, n_rows // 4))  # >=4 steps when the size allows
    vmem_cap = max(128, vmem_budget // (2 * bytes_per_row))
    tile = min(tile, vmem_cap, max_tile_m)
    tile = max(128, _round_up(tile, 128))    # lane/sublane friendly alignment
    return n_rows if tile >= n_rows else tile


# ----------------------------------------------------------------------------
# Factory: one-time weight preparation + a jitted forward for graph['nodes'].
# ----------------------------------------------------------------------------
def make_selective_encode_decode_mlp(feat_ind, params, num_node_features, *,
                                     compute_dtype=jnp.bfloat16,
                                     out_dtype=jnp.float32,
                                     max_tile_m=8192):
    """Returns forward(graph) -> [graph with 'nodes' replaced by decoded]."""
    f = int(num_node_features)
    w1, b1, w2, b2, w3, b3 = (params[k] for k in
                              ("w1", "b1", "w2", "b2", "w3", "b3"))
    d_in, hid = w1.shape
    d_out = w3.shape[1]
    assert len(feat_ind) == d_in
    p = _pack_factor(f)

    # (1) fold the column selection into W1 (scatter-ADD handles duplicates).
    idx = jnp.asarray(feat_ind, jnp.int32)
    w1_fold = jnp.zeros((f, hid), jnp.float32).at[idx].add(
        w1.astype(jnp.float32))

    # (2) row-pack: block-diagonal weights + lane-tiled biases (hoisted; runs
    #     once per (feat_ind, params), never on the per-call path).
    w1_bd = _block_diag(w1_fold, p).astype(compute_dtype)      # (p*f,   p*hid)
    w2_bd = _block_diag(w2, p).astype(compute_dtype)           # (p*hid, p*hid)
    w3_bd = _block_diag(w3, p).astype(compute_dtype)           # (p*hid, p*dout)
    b1_bd = jnp.tile(jnp.reshape(b1, (1, hid)), (1, p)).astype(jnp.float32)
    b2_bd = jnp.tile(jnp.reshape(b2, (1, hid)), (1, p)).astype(jnp.float32)
    b3_bd = jnp.tile(jnp.reshape(b3, (1, d_out)), (1, p)).astype(jnp.float32)
    packed_weights = (w1_bd, b1_bd, w2_bd, b2_bd, w3_bd, b3_bd)
    weight_bytes = sum(int(a.size) * a.dtype.itemsize for a in packed_weights)

    vmem_budget = _vmem_budget_bytes()
    in_itemsize = jnp.dtype(compute_dtype).itemsize
    out_itemsize = jnp.dtype(out_dtype).itemsize
    bytes_per_row = p * f * in_itemsize + p * d_out * out_itemsize

    @jax.jit
    def _forward_nodes(nodes, w1_bd, b1_bd, w2_bd, b2_bd, w3_bd, b3_bd):
        n = nodes.shape[0]
        n_pad = _round_up(n, p)
        x = nodes.astype(compute_dtype)
        if n_pad != n:
            x = jnp.pad(x, ((0, n_pad - n), (0, 0)))   # zero rows: harmless
        n_rows = n_pad // p
        xp = x.reshape(n_rows, p * f)                   # contiguous reshape

        tile_m = _choose_tile_m(n_rows, bytes_per_row, max_tile_m, vmem_budget)
        grid = (pl.cdiv(n_rows, tile_m),)               # tail block is masked
        full = lambda i: (0, 0)                         # resident weight blocks

        flops = 2 * n_rows * ((p * f) * (p * hid)
                              + (p * hid) * (p * hid)
                              + (p * hid) * (p * d_out))
        bytes_accessed = n_rows * bytes_per_row + weight_bytes

        yp = pl.pallas_call(
            _encode_decode_kernel,
            out_shape=jax.ShapeDtypeStruct((n_rows, p * d_out), out_dtype),
            grid_spec=pltpu.PrefetchScalarGridSpec(
                num_scalar_prefetch=0,
                grid=grid,
                in_specs=[
                    pl.BlockSpec((tile_m, p * f), lambda i: (i, 0)),  # nodes
                    pl.BlockSpec((p * f, p * hid), full),             # w1_bd
                    pl.BlockSpec((1, p * hid), full),                 # b1_bd
                    pl.BlockSpec((p * hid, p * hid), full),           # w2_bd
                    pl.BlockSpec((1, p * hid), full),                 # b2_bd
                    pl.BlockSpec((p * hid, p * d_out), full),         # w3_bd
                    pl.BlockSpec((1, p * d_out), full),               # b3_bd
                ],
                out_specs=pl.BlockSpec((tile_m, p * d_out), lambda i: (i, 0)),
            ),
            compiler_params=pltpu.CompilerParams(
                dimension_semantics=("parallel",)),
            cost_estimate=pl.CostEstimate(
                flops=flops, transcendentals=0, bytes_accessed=bytes_accessed),
        )(xp, w1_bd, b1_bd, w2_bd, b2_bd, w3_bd, b3_bd)

        y = yp.reshape(n_pad, d_out)                    # contiguous reshape
        return y[:n] if n_pad != n else y

    def forward(graph):
        decoded = _forward_nodes(graph["nodes"], *packed_weights)
        new_graph = dict(graph)
        new_graph["nodes"] = decoded      # arity == 1 => replace 'nodes'
        return [new_graph]

    return forward


# ----------------------------------------------------------------------------
# Deterministic parameter init mirroring apply_init: init_fn (Xavier-uniform)
# for dim>1 params, uniform(-1, 1) for 1-D params / biases.
# ----------------------------------------------------------------------------
def _xavier_uniform(key, shape):
    fan_in, fan_out = shape
    limit = (6.0 / (fan_in + fan_out)) ** 0.5
    return jax.random.uniform(key, shape, jnp.float32, -limit, limit)


def init_params(key, d_in, hidden, d_out):
    ks = jax.random.split(key, 6)
    return {
        "w1": _xavier_uniform(ks[0], (d_in, hidden)),
        "b1": jax.random.uniform(ks[1], (1, hidden), jnp.float32, -1.0, 1.0),
        "w2": _xavier_uniform(ks[2], (hidden, hidden)),
        "b2": jax.random.uniform(ks[3], (1, hidden), jnp.float32, -1.0, 1.0),
        "w3": _xavier_uniform(ks[4], (hidden, d_out)),
        "b3": jax.random.uniform(ks[5], (1, d_out), jnp.float32, -1.0, 1.0),
    }


def _reference(nodes, feat_ind, params, compute_dtype=jnp.bfloat16):
    """Plain-JAX mirror of the module (gather, then MLP), using the same
    precision choices as the kernel path (bf16 MXU operands, f32 accumulate,
    f32 bias/ReLU)."""
    idx = jnp.asarray(feat_ind)
    x = nodes[:, idx].astype(compute_dtype)
    h = jnp.dot(x, params["w1"].astype(compute_dtype),
                preferred_element_type=jnp.float32) + params["b1"]
    h = jnp.maximum(h, 0.0)
    h = jnp.dot(h.astype(compute_dtype), params["w2"].astype(compute_dtype),
                preferred_element_type=jnp.float32) + params["b2"]
    h = jnp.maximum(h, 0.0)
    return jnp.dot(h.astype(compute_dtype), params["w3"].astype(compute_dtype),
                   preferred_element_type=jnp.float32) + params["b3"]


if __name__ == "__main__":
    key = jax.random.PRNGKey(0)
    k_nodes1, k_nodes2, k_params = jax.random.split(key, 3)

    # Small shapes consistent with the module: node-attribute matrices.
    F = 16                          # num_node_features (pack factor = 8)
    feat_ind = [0, 2, 5, 7]         # selective feature indices (arity == 1)
    HIDDEN, D_OUT = 32, 16
    params = init_params(k_params, len(feat_ind), HIDDEN, D_OUT)

    # One-time prep (gather fold, block-diagonal packing, casts).
    forward = make_selective_encode_decode_mlp(feat_ind, params, F)

    # Case 1: small graph, N not a multiple of the pack factor
    #         (exercises the zero-pad path and a single full-dim grid step).
    N1 = 203
    nodes1 = jax.random.normal(k_nodes1, (N1, F), jnp.float32).astype(jnp.bfloat16)
    graph1 = {"nodes": nodes1, "globals": jnp.zeros((1, 1), jnp.float32)}
    out1 = forward(graph1)[0]["nodes"]
    jax.block_until_ready(out1)
    ref1 = _reference(nodes1, feat_ind, params)
    assert out1.shape == (N1, D_OUT) and out1.dtype == jnp.float32
    assert jnp.allclose(out1, ref1, atol=1e-2, rtol=1e-2)

    # Case 2: larger graph -> multi-step grid with a masked tail block
    #         (exercises the pipelined / parallel-axis path).
    N2 = 16389
    nodes2 = jax.random.normal(k_nodes2, (N2, F), jnp.float32).astype(jnp.bfloat16)
    graph2 = {"nodes": nodes2, "globals": jnp.zeros((1, 1), jnp.float32)}
    out2 = forward(graph2)[0]["nodes"]
    jax.block_until_ready(out2)
    ref2 = _reference(nodes2, feat_ind, params)
    assert out2.shape == (N2, D_OUT) and out2.dtype == jnp.float32
    assert jnp.allclose(out2, ref2, atol=1e-2, rtol=1e-2)

    print("KERNEL_OK")
</pallas_src>

<mosaic_0001>
module attributes {stable_mosaic.version = 11 : i64} {
  func.func @_encode_decode_kernel(%arg0: i32, %arg1: memref<26x128xbf16, #tpu.memory_space<vmem>>, %arg2: memref<128x256xbf16, #tpu.memory_space<vmem>>, %arg3: memref<1x256xf32, #tpu.memory_space<vmem>>, %arg4: memref<256x256xbf16, #tpu.memory_space<vmem>>, %arg5: memref<1x256xf32, #tpu.memory_space<vmem>>, %arg6: memref<256x128xbf16, #tpu.memory_space<vmem>>, %arg7: memref<1x128xf32, #tpu.memory_space<vmem>>, %arg8: memref<26x128xf32, #tpu.memory_space<vmem>>) attributes {dimension_semantics = [#tpu.dimension_semantics<parallel>], iteration_bounds = array<i64: 1>, scalar_prefetch = 0 : i64, scratch_operands = 0 : i64, tpu.core_type = #tpu.core_type<tc>, window_params = [{transform_indices = @transform_0, window_bounds = array<i64: 26, 128>}, {pipeline_mode = #tpu.pipeline_mode<synchronous>, transform_indices = @transform_1, window_bounds = array<i64: 128, 256>}, {pipeline_mode = #tpu.pipeline_mode<synchronous>, transform_indices = @transform_2, window_bounds = array<i64: 1, 256>}, {pipeline_mode = #tpu.pipeline_mode<synchronous>, transform_indices = @transform_3, window_bounds = array<i64: 256, 256>}, {pipeline_mode = #tpu.pipeline_mode<synchronous>, transform_indices = @transform_4, window_bounds = array<i64: 1, 256>}, {pipeline_mode = #tpu.pipeline_mode<synchronous>, transform_indices = @transform_5, window_bounds = array<i64: 256, 128>}, {pipeline_mode = #tpu.pipeline_mode<synchronous>, transform_indices = @transform_6, window_bounds = array<i64: 1, 128>}, {transform_indices = @transform_7, window_bounds = array<i64: 26, 128>}]} {
    %c0 = arith.constant 0 : index
    %c0_0 = arith.constant 0 : index
    %0 = vector.load %arg1[%c0, %c0_0] : memref<26x128xbf16, #tpu.memory_space<vmem>>, vector<26x128xbf16>
    %c0_1 = arith.constant 0 : index
    %c0_2 = arith.constant 0 : index
    %1 = vector.load %arg2[%c0_1, %c0_2] : memref<128x256xbf16, #tpu.memory_space<vmem>>, vector<128x256xbf16>
    %cst = arith.constant dense<0.000000e+00> : vector<26x256xf32>
    %2 = tpu.matmul %0, %1, %cst {dimension_numbers = #tpu.dot_dimension_numbers<[1], [0], [0], [1], [0, 0, 1, 1], [], []>} : vector<26x128xbf16>, vector<128x256xbf16>, vector<26x256xf32> -> vector<26x256xf32>
    %c0_3 = arith.constant 0 : index
    %c0_4 = arith.constant 0 : index
    %3 = vector.load %arg3[%c0_3, %c0_4] : memref<1x256xf32, #tpu.memory_space<vmem>>, vector<1x256xf32>
    %4 = vector.broadcast %3 : vector<1x256xf32> to vector<26x256xf32>
    %5 = arith.addf %2, %4 : vector<26x256xf32>
    %cst_5 = arith.constant 0.000000e+00 : f32
    %6 = vector.broadcast %cst_5 : f32 to vector<26x256xf32>
    %7 = arith.maximumf %5, %6 : vector<26x256xf32>
    %8 = arith.truncf %7 : vector<26x256xf32> to vector<26x256xbf16>
    %c0_6 = arith.constant 0 : index
    %c0_7 = arith.constant 0 : index
    %9 = vector.load %arg4[%c0_6, %c0_7] : memref<256x256xbf16, #tpu.memory_space<vmem>>, vector<256x256xbf16>
    %cst_8 = arith.constant dense<0.000000e+00> : vector<26x256xf32>
    %10 = tpu.matmul %8, %9, %cst_8 {dimension_numbers = #tpu.dot_dimension_numbers<[1], [0], [0], [1], [0, 0, 1, 1], [], []>} : vector<26x256xbf16>, vector<256x256xbf16>, vector<26x256xf32> -> vector<26x256xf32>
    %c0_9 = arith.constant 0 : index
    %c0_10 = arith.constant 0 : index
    %11 = vector.load %arg5[%c0_9, %c0_10] : memref<1x256xf32, #tpu.memory_space<vmem>>, vector<1x256xf32>
    %12 = vector.broadcast %11 : vector<1x256xf32> to vector<26x256xf32>
    %13 = arith.addf %10, %12 : vector<26x256xf32>
    %cst_11 = arith.constant 0.000000e+00 : f32
    %14 = vector.broadcast %cst_11 : f32 to vector<26x256xf32>
    %15 = arith.maximumf %13, %14 : vector<26x256xf32>
    %16 = arith.truncf %15 : vector<26x256xf32> to vector<26x256xbf16>
    %c0_12 = arith.constant 0 : index
    %c0_13 = arith.constant 0 : index
    %17 = vector.load %arg6[%c0_12, %c0_13] : memref<256x128xbf16, #tpu.memory_space<vmem>>, vector<256x128xbf16>
    %cst_14 = arith.constant dense<0.000000e+00> : vector<26x128xf32>
    %18 = tpu.matmul %16, %17, %cst_14 {dimension_numbers = #tpu.dot_dimension_numbers<[1], [0], [0], [1], [0, 0, 1, 1], [], []>} : vector<26x256xbf16>, vector<256x128xbf16>, vector<26x128xf32> -> vector<26x128xf32>
    %c0_15 = arith.constant 0 : index
    %c0_16 = arith.constant 0 : index
    %19 = vector.load %arg7[%c0_15, %c0_16] : memref<1x128xf32, #tpu.memory_space<vmem>>, vector<1x128xf32>
    %20 = vector.broadcast %19 : vector<1x128xf32> to vector<26x128xf32>
    %21 = arith.addf %18, %20 : vector<26x128xf32>
    %c0_17 = arith.constant 0 : index
    %c0_18 = arith.constant 0 : index
    %22 = vector.load %arg8[%c0_17, %c0_18] : memref<26x128xf32, #tpu.memory_space<vmem>>, vector<26x128xf32>
    tpu.vector_store %arg8[%c0_17, %c0_18], %21 {strides = array<i32>} : memref<26x128xf32, #tpu.memory_space<vmem>>, vector<26x128xf32>,
    return
  }
  func.func @transform_0(%arg0: i32) -> (i32, i32) {
    %c0_i32 = arith.constant 0 : i32
    %c0_i32_0 = arith.constant 0 : i32
    return %arg0, %c0_i32 : i32, i32
  }
  func.func @transform_1(%arg0: i32) -> (i32, i32) {
    %c0_i32 = arith.constant 0 : i32
    %c0_i32_0 = arith.constant 0 : i32
    %c0_i32_1 = arith.constant 0 : i32
    return %c0_i32, %c0_i32_0 : i32, i32
  }
  func.func @transform_2(%arg0: i32) -> (i32, i32) {
    %c0_i32 = arith.constant 0 : i32
    %c0_i32_0 = arith.constant 0 : i32
    %c0_i32_1 = arith.constant 0 : i32
    return %c0_i32, %c0_i32_0 : i32, i32
  }
  func.func @transform_3(%arg0: i32) -> (i32, i32) {
    %c0_i32 = arith.constant 0 : i32
    %c0_i32_0 = arith.constant 0 : i32
    %c0_i32_1 = arith.constant 0 : i32
    return %c0_i32, %c0_i32_0 : i32, i32
  }
  func.func @transform_4(%arg0: i32) -> (i32, i32) {
    %c0_i32 = arith.constant 0 : i32
    %c0_i32_0 = arith.constant 0 : i32
    %c0_i32_1 = arith.constant 0 : i32
    return %c0_i32, %c0_i32_0 : i32, i32
  }
  func.func @transform_5(%arg0: i32) -> (i32, i32) {
    %c0_i32 = arith.constant 0 : i32
    %c0_i32_0 = arith.constant 0 : i32
    %c0_i32_1 = arith.constant 0 : i32
    return %c0_i32, %c0_i32_0 : i32, i32
  }
  func.func @transform_6(%arg0: i32) -> (i32, i32) {
    %c0_i32 = arith.constant 0 : i32
    %c0_i32_0 = arith.constant 0 : i32
    %c0_i32_1 = arith.constant 0 : i32
    return %c0_i32, %c0_i32_0 : i32, i32
  }
  func.func @transform_7(%arg0: i32) -> (i32, i32) {
    %c0_i32 = arith.constant 0 : i32
    %c0_i32_0 = arith.constant 0 : i32
    return %arg0, %c0_i32 : i32, i32
  }
}

</mosaic_0001>

<bundles_post_ra>
// kernel: _forward_nodes.1
= control target key start
LH: loop header
LB: loop body
LE: loop exit
PB: predicated region body
PF: predicated region fallthrough
CT: control target
= control target key end

     0   :  { %12 = vsyncpa [#allocation3], 0  ;;  %s1035_s27 = smov [#allocation2]   ;;  %s1036_s29 = smov 64   ;;  %s1399_s0 = inlined_call_operand.vmem [shape: bf16[26,128], index: 0, kind: input, shape index: {}]   ;;  %s1400_s1 = inlined_call_operand.vmem [shape: bf16[128,256], index: 1, kind: input, shape index: {}]   ;;  %s1401_s2 = inlined_call_operand.vmem [shape: f32[1,256], index: 2, kind: input, shape index: {}]   ;;  %s1402_s3 = inlined_call_operand.vmem [shape: bf16[256,256], index: 3, kind: input, shape index: {}]   ;;  %s1403_s4 = inlined_call_operand.vmem [shape: f32[1,256], index: 4, kind: input, shape index: {}]   ;;  %s1404_s5 = inlined_call_operand.hbm [shape: bf16[256,128], index: 5, kind: input, shape index: {}]   ;;  %s1405_s6 = inlined_call_operand.vmem [shape: f32[1,128], index: 6, kind: input, shape index: {}]   ;;  %s1406_s7 = inlined_call_operand.vmem [shape: f32[26,128], index: 7, kind: output, shape index: {}]  }
   0x1   :  { %s27_s26 = sshll.u32 %s1404_s5, 4  ;;  %s29_s28 = sshll.u32 %s1035_s27, 4  ;;  %s28_s26 = int_to_ptr.hbm [resolvable:$true] %s27_s26  ;;  %s30_s28 = int_to_ptr.vmem [resolvable:$true] %s29_s28 }
   0x2   :  { %s1037_s30 = smov 4  }
   0x3   :  { %35 = dma.hbm_to_vmem [thread:$0]  %s28_s26, 2048, %s30_s28, [#allocation3], %s1036_s29, %s1036_s29, %s1037_s30  }
   0x4   :  { %1033 = dma.done.wait [#allocation3], 2048  }
   0x5   :  { %1034 = vsyncadd [#allocation3], 4294965248  ;;  %v741_v0 = vld [vmem:[%s1400_s1 + $0x70] sm:$0xf]  ;;  %v956_v1 = vld [vmem:[%s1400_s1 + $0x74] sm:$0xf0] }
   0x6   :  { %v955_v2 = vld [vmem:[%s1400_s1 + $0x74] sm:$0xf]  ;;  %v742_v3 = vor.u32 %v956_v1, %v741_v0  ;;  %v743_v4 = vld [vmem:[%s1400_s1 + $0x78] sm:$0xf0]  ;;  %v733_v5 = vld [vmem:[%s1400_s1 + $0x60] sm:$0xf] }
   0x7   :  { %v954_v6 = vld [vmem:[%s1400_s1 + $0x64] sm:$0xf0]  ;;  %v746_v7 = vor.u32 %v955_v2, %v743_v4  ;;  %v953_v8 = vld [vmem:[%s1400_s1 + $0x64] sm:$0xf]  ;;  %v735_v9 = vld [vmem:[%s1400_s1 + $0x68] sm:$0xf0] }
   0x8   :  { %160 = vmatpush.bf16.msra.mxu0 %v742_v3  ;;  %v734_v10 = vor.u32 %v954_v6, %v733_v5  ;;  %v738_v11 = vor.u32 %v953_v8, %v735_v9  ;;  %v725_v12 = vld [vmem:[%s1400_s1 + $0x50] sm:$0xf]  ;;  %v952_v13 = vld [vmem:[%s1400_s1 + $0x54] sm:$0xf0]  ;;  %v951_v14 = vld [vmem:[%s1400_s1 + $0x54] sm:$0xf] }
   0x9   :  { %179 = vmatpush.bf16.msra.mxu1 %v746_v7  ;;  %v727_v15 = vld [vmem:[%s1400_s1 + $0x58] sm:$0xf0]  ;;  %v726_v16 = vor.u32 %v952_v13, %v725_v12  ;;  %v717_v18 = vld [vmem:[%s1400_s1 + $0x40] sm:$0xf]  ;;  %v950_v19 = vld [vmem:[%s1400_s1 + $0x44] sm:$0xf0] }
   0xa   :  { %v730_v17 = vor.u32 %v951_v14, %v727_v15  ;;  %v949_v20 = vld [vmem:[%s1400_s1 + $0x44] sm:$0xf]  ;;  %v719_v21 = vld [vmem:[%s1400_s1 + $0x48] sm:$0xf0]  ;;  %v718_v22 = vor.u32 %v950_v19, %v717_v18  ;;  %v709_v24 = vld [vmem:[%s1400_s1 + $0x30] sm:$0xf] }
   0xb   :  { %v722_v23 = vor.u32 %v949_v20, %v719_v21  ;;  %v948_v25 = vld [vmem:[%s1400_s1 + $0x34] sm:$0xf0]  ;;  %v947_v26 = vld [vmem:[%s1400_s1 + $0x34] sm:$0xf]  ;;  %v711_v27 = vld [vmem:[%s1400_s1 + $0x38] sm:$0xf0] }
   0xc   :  { %161 = vmatpush.bf16.msra.mxu0 %v734_v10  ;;  %v710_v28 = vor.u32 %v948_v25, %v709_v24  ;;  %v714_v29 = vor.u32 %v947_v26, %v711_v27  ;;  %v701_v30 = vld [vmem:[%s1400_s1 + $0x20] sm:$0xf]  ;;  %v946_v31 = vld [vmem:[%s1400_s1 + $0x24] sm:$0xf0]  ;;  %v945_v32 = vld [vmem:[%s1400_s1 + $0x24] sm:$0xf] }
   0xd   :  { %180 = vmatpush.bf16.msra.mxu1 %v738_v11  ;;  %v703_v33 = vld [vmem:[%s1400_s1 + $0x28] sm:$0xf0]  ;;  %v702_v34 = vor.u32 %v946_v31, %v701_v30  ;;  %v805_v35 = vld [vmem:[%s1402_s3 + $0x70] sm:$0xf]  ;;  %v972_v36 = vld [vmem:[%s1402_s3 + $0x74] sm:$0xf0] }
   0xe   :  { %v869_v37 = vld [vmem:[%s1402_s3 + $0xf0] sm:$0xf]  ;;  %v706_v38 = vor.u32 %v945_v32, %v703_v33  ;;  %v944_v40 = vld [vmem:[%s1400_s1 + $0x14] sm:$0xf0]  ;;  %v806_v41 = vor.u32 %v972_v36, %v805_v35  ;;  %v943_v43 = vld [vmem:[%s1400_s1 + $0x14] sm:$0xf] }
   0xf   :  { %v693_v39 = vld [vmem:[%s1400_s1 + $0x10] sm:$0xf]  ;;  %v988_v42 = vld [vmem:[%s1402_s3 + $0xf4] sm:$0xf0]  ;;  %v695_v44 = vld [vmem:[%s1400_s1 + $0x18] sm:$0xf0] }
  0x10   :  { %162 = vmatpush.bf16.msra.mxu0 %v726_v16  ;;  %v870_v45 = vor.u32 %v988_v42, %v869_v37  ;;  %v797_v46 = vld [vmem:[%s1402_s3 + $0x60] sm:$0xf]  ;;  %408 = vmatpush.bf16.msra.mxu2 %v806_v41  ;;  %v970_v48 = vld [vmem:[%s1402_s3 + $0x64] sm:$0xf0]  ;;  %v694_v51 = vor.u32 %v944_v40, %v693_v39  ;;  %v941_v53 = vld [vmem:[%s1400_s1 + $0x4] sm:$0xf]  ;;  %v698_v57 = vor.u32 %v943_v43, %v695_v44 }
  0x11   :  { %181 = vmatpush.bf16.msra.mxu1 %v730_v17  ;;  %v685_v47 = vld [vmem:[%s1400_s1] sm:$0xf]  ;;  %v986_v50 = vld [vmem:[%s1402_s3 + $0xe4] sm:$0xf0]  ;;  %v687_v54 = vld [vmem:[%s1400_s1 + $0x8] sm:$0xf0]  ;;  %v798_v55 = vor.u32 %v970_v48, %v797_v46 }
  0x12   :  { %v861_v49 = vld [vmem:[%s1402_s3 + $0xe0] sm:$0xf]  ;;  %v942_v52 = vld [vmem:[%s1400_s1 + $0x4] sm:$0xf0]  ;;  %427 = vmatpush.bf16.msra.mxu3 %v870_v45  ;;  %v971_v58 = vld [vmem:[%s1402_s3 + $0x74] sm:$0xf]  ;;  %v690_v7 = vor.u32 %v941_v53, %v687_v54 }
  0x13   :  { %v862_v56 = vor.u32 %v986_v50, %v861_v49  ;;  %v789_v59 = vld [vmem:[%s1402_s3 + $0x50] sm:$0xf]  ;;  %v968_v60 = vld [vmem:[%s1402_s3 + $0x54] sm:$0xf0]  ;;  %v807_v61 = vld [vmem:[%s1402_s3 + $0x78] sm:$0xf0]  ;;  %v686_v3 = vor.u32 %v942_v52, %v685_v47 }
  0x14   :  { %163 = vmatpush.bf16.msra.mxu0 %v718_v22  ;;  %v853_v62 = vld [vmem:[%s1402_s3 + $0xd0] sm:$0xf]  ;;  %v984_v63 = vld [vmem:[%s1402_s3 + $0xd4] sm:$0xf0]  ;;  %v987_v0 = vld [vmem:[%s1402_s3 + $0xf4] sm:$0xf]  ;;  %409 = vmatpush.bf16.msra.mxu2 %v798_v55  ;;  %v790_v2 = vor.u32 %v968_v60, %v789_v59  ;;  %v810_v8 = vor.u32 %v971_v58, %v807_v61 }
  0x15   :  { %182 = vmatpush.bf16.msra.mxu1 %v722_v23  ;;  %v871_v1 = vld [vmem:[%s1402_s3 + $0xf8] sm:$0xf0]  ;;  %v854_v4 = vor.u32 %v984_v63, %v853_v62  ;;  %v781_v5 = vld [vmem:[%s1402_s3 + $0x40] sm:$0xf]  ;;  %v966_v6 = vld [vmem:[%s1402_s3 + $0x44] sm:$0xf0] }
  0x16   :  { %428 = vmatpush.bf16.msra.mxu3 %v862_v56  ;;  %v845_v9 = vld [vmem:[%s1402_s3 + $0xc0] sm:$0xf]  ;;  %v982_v10 = vld [vmem:[%s1402_s3 + $0xc4] sm:$0xf0]  ;;  %v874_v11 = vor.u32 %v987_v0, %v871_v1  ;;  %v969_v12 = vld [vmem:[%s1402_s3 + $0x64] sm:$0xf]  ;;  %v782_v17 = vor.u32 %v966_v6, %v781_v5 }
  0x17   :  { %v799_v13 = vld [vmem:[%s1402_s3 + $0x68] sm:$0xf0]  ;;  %v939_v14 = vld [vmem:[%s1399_s0] sm:$0xff]  ;;  %v846_v18 = vor.u32 %v982_v10, %v845_v9  ;;  %v967_v21 = vld [vmem:[%s1402_s3 + $0x54] sm:$0xf] }
  0x18   :  { %164 = vmatpush.bf16.msra.mxu0 %v710_v28  ;;  %v985_v15 = vld [vmem:[%s1402_s3 + $0xe4] sm:$0xf]  ;;  %v863_v16 = vld [vmem:[%s1402_s3 + $0xe8] sm:$0xf0]  ;;  %410 = vmatpush.bf16.msra.mxu2 %v790_v2  ;;  %v802_v19 = vor.u32 %v969_v12, %v799_v13  ;;  %v791_v22 = vld [vmem:[%s1402_s3 + $0x58] sm:$0xf0] }
  0x19   :  { %183 = vmatpush.bf16.msra.mxu1 %v714_v29  ;;  %v866_v20 = vor.u32 %v985_v15, %v863_v16  ;;  %v983_v23 = vld [vmem:[%s1402_s3 + $0xd4] sm:$0xf]  ;;  %v855_v24 = vld [vmem:[%s1402_s3 + $0xd8] sm:$0xf0]  ;;  %v794_v25 = vor.u32 %v967_v21, %v791_v22  ;;  %v965_v27 = vld [vmem:[%s1402_s3 + $0x44] sm:$0xf] }
  0x1a   :  { %429 = vmatpush.bf16.msra.mxu3 %v854_v4  ;;  %v858_v26 = vor.u32 %v983_v23, %v855_v24  ;;  %v783_v28 = vld [vmem:[%s1402_s3 + $0x48] sm:$0xf0]  ;;  %v981_v29 = vld [vmem:[%s1402_s3 + $0xc4] sm:$0xf]  ;;  %v681_v33 = vld [vmem:[%s1399_s0 + $0x8] sm:$0xf] }
  0x1b   :  { %v847_v30 = vld [vmem:[%s1402_s3 + $0xc8] sm:$0xf0]  ;;  %v786_v31 = vor.u32 %v965_v27, %v783_v28  ;;  %v773_v36 = vld [vmem:[%s1402_s3 + $0x30] sm:$0xf]  ;;  %v964_v37 = vld [vmem:[%s1402_s3 + $0x34] sm:$0xf0] }
  0x1c   :  { %165 = vmatpush.bf16.msra.mxu0 %v702_v34  ;;  %411 = vmatpush.bf16.msra.mxu2 %v782_v17  ;;  %v850_v32 = vor.u32 %v981_v29, %v847_v30  ;;  %v940_v34 = vld [vmem:[%s1399_s0 + $0x8] sm:$0x10]  ;;  %v774_v39 = vor.u32 %v964_v37, %v773_v36  ;;  %v980_v40 = vld [vmem:[%s1402_s3 + $0xb4] sm:$0xf0]  ;;  %v963_v41 = vld [vmem:[%s1402_s3 + $0x34] sm:$0xf] }
  0x1d   :  { %184 = vmatpush.bf16.msra.mxu1 %v706_v38  ;;  %v682_v35 = vor.u32 %v940_v34, %v681_v33  ;;  %v837_v38 = vld [vmem:[%s1402_s3 + $0xb0] sm:$0xf]  ;;  %v775_v42 = vld [vmem:[%s1402_s3 + $0x38] sm:$0xf0]  ;;  %v979_v45 = vld [vmem:[%s1402_s3 + $0xb4] sm:$0xf] }
  0x1e   :  { %430 = vmatpush.bf16.msra.mxu3 %v846_v18  ;;  %v838_v43 = vor.u32 %v980_v40, %v837_v38  ;;  %v778_v44 = vor.u32 %v963_v41, %v775_v42  ;;  %v839_v46 = vld [vmem:[%s1402_s3 + $0xb8] sm:$0xf0]  ;;  %v765_v48 = vld [vmem:[%s1402_s3 + $0x20] sm:$0xf]  ;;  %v962_v49 = vld [vmem:[%s1402_s3 + $0x24] sm:$0xf0] }
  0x1f   :  { %v842_v47 = vor.u32 %v979_v45, %v839_v46  ;;  %v766_v50 = vor.u32 %v962_v49, %v765_v48  ;;  %v978_v52 = vld [vmem:[%s1402_s3 + $0xa4] sm:$0xf0]  ;;  %v961_v53 = vld [vmem:[%s1402_s3 + $0x24] sm:$0xf]  ;;  %v767_v55 = vld [vmem:[%s1402_s3 + $0x28] sm:$0xf0] }
  0x20   :  { %166 = vmatpush.bf16.msra.mxu0 %v694_v51  ;;  %412 = vmatpush.bf16.msra.mxu2 %v774_v39  ;;  %v829_v51 = vld [vmem:[%s1402_s3 + $0xa0] sm:$0xf]  ;;  %v977_v56 = vld [vmem:[%s1402_s3 + $0xa4] sm:$0xf]  ;;  %v770_v58 = vor.u32 %v961_v53, %v767_v55  ;;  %v757_v60 = vld [vmem:[%s1402_s3 + $0x10] sm:$0xf] }
  0x21   :  { %185 = vmatpush.bf16.msra.mxu1 %v698_v57  ;;  %v830_v54 = vor.u32 %v978_v52, %v829_v51  ;;  %v831_v57 = vld [vmem:[%s1402_s3 + $0xa8] sm:$0xf0]  ;;  %v960_v61 = vld [vmem:[%s1402_s3 + $0x14] sm:$0xf0]  ;;  %v821_v62 = vld [vmem:[%s1402_s3 + $0x90] sm:$0xf] }
  0x22   :  { %431 = vmatpush.bf16.msra.mxu3 %v838_v43  ;;  %v834_v59 = vor.u32 %v977_v56, %v831_v57  ;;  %v758_v63 = vor.u32 %v960_v61, %v757_v60  ;;  %v976_v0 = vld [vmem:[%s1402_s3 + $0x94] sm:$0xf0]  ;;  %v959_v1 = vld [vmem:[%s1402_s3 + $0x14] sm:$0xf]  ;;  %v759_v2 = vld [vmem:[%s1402_s3 + $0x18] sm:$0xf0] }
  0x23   :  { %v762_v4 = vor.u32 %v959_v1, %v759_v2  ;;  %v975_v5 = vld [vmem:[%s1402_s3 + $0x94] sm:$0xf]  ;;  %v823_v6 = vld [vmem:[%s1402_s3 + $0x98] sm:$0xf0]  ;;  %v958_v9 = vld [vmem:[%s1402_s3 + $0x4] sm:$0xf0] }
  0x24   :  { %167 = vmatpush.bf16.msra.mxu0 %v686_v3  ;;  %413 = vmatpush.bf16.msra.mxu2 %v766_v50  ;;  %v822_v3 = vor.u32 %v976_v0, %v821_v62  ;;  %v813_v10 = vld [vmem:[%s1402_s3 + $0x80] sm:$0xf]  ;;  %v974_v12 = vld [vmem:[%s1402_s3 + $0x84] sm:$0xf0]  ;;  %v957_v13 = vld [vmem:[%s1402_s3 + $0x4] sm:$0xf] }
  0x25   :  { %186 = vmatpush.bf16.msra.mxu1 %v690_v7  ;;  %v826_v7 = vor.u32 %v975_v5, %v823_v6  ;;  %v814_v15 = vor.u32 %v974_v12, %v813_v10  ;;  %v973_v17 = vld [vmem:[%s1402_s3 + $0x84] sm:$0xf]  ;;  %v815_v18 = vld [vmem:[%s1402_s3 + $0x88] sm:$0xf0]  ;;  %v1004_v22 = vld [vmem:[#allocation2 + $0x78] sm:$0xff] }
  0x26   :  { %432 = vmatpush.bf16.msra.mxu3 %v830_v54  ;;  %v996_v23 = vld [vmem:[#allocation2 + $0x38] sm:$0xff]  ;;  %v1002_v29 = vld [vmem:[#allocation2 + $0x68] sm:$0xff]  ;;  %v1001_v37 = vld [vmem:[#allocation2 + $0x60] sm:$0xff] }
  0x27   :  { %168 = vmatmul.bf16.vlgmr.msra.gmra.mxu0 %v939_v14  ;;  %v994_v30 = vld [vmem:[#allocation2 + $0x28] sm:$0xff]  ;;  %v999_v60 = vld [vmem:[#allocation2 + $0x50] sm:$0xff]  ;;  %v992_v61 = vld [vmem:[#allocation2 + $0x18] sm:$0xff] }
  0x28   :  { %446 = vmatpush.bf16.msrb.mxu0 %v810_v8  ;;  %187 = vmatmul.bf16.vlgmr.msra.gmra.mxu1 %v939_v14  ;;  %v749_v8 = vld [vmem:[%s1402_s3] sm:$0xf]  ;;  %v751_v14 = vld [vmem:[%s1402_s3 + $0x8] sm:$0xf0] }
  0x29   :  { %465 = vmatpush.bf16.msrb.mxu1 %v874_v11  ;;  %414 = vmatpush.bf16.msra.mxu2 %v758_v63  ;;  %v750_v11 = vor.u32 %v958_v9, %v749_v8  ;;  %v754_v16 = vor.u32 %v957_v13, %v751_v14  ;;  %v998_v62 = vld [vmem:[#allocation2 + $0x48] sm:$0xff]  ;;  %v991_v63 = vld [vmem:[#allocation2 + $0x10] sm:$0xff]  ;;  %v997_v0 = vld [vmem:[#allocation2 + $0x40] sm:$0xff] }
  0x2a   :  { %433 = vmatpush.bf16.msra.mxu3 %v822_v3  ;;  %v990_v1 = vld [vmem:[#allocation2 + $0x8] sm:$0xff]  ;;  %v989_v2 = vld [vmem:[#allocation2] sm:$0xff] }
  0x2b   :  { %v242_v3 = vld [vmem:[%s1403_s4] sm:$0x3] }
  0x2c   :  { %447 = vmatpush.bf16.msrb.mxu0 %v802_v19  ;;  %v818_v19 = vor.u32 %v973_v17, %v815_v18  ;;  %v245_v5 = vperm.slane %v242_v3, 1  ;;  %v244_v9 = vperm.slane %v242_v3, 0 }
  0x2d   :  { %466 = vmatpush.bf16.msrb.mxu1 %v866_v20  ;;  %415 = vmatpush.bf16.msra.mxu2 %v750_v11  ;;  %v62_v20 = vld [vmem:[%s1401_s2] sm:$0x3] }
  0x2e   :  { %434 = vmatpush.bf16.msra.mxu3 %v814_v15  ;;  %v64_v27 = vperm.slane %v62_v20, 0  ;;  %v65_v28 = vperm.slane %v62_v20, 1 }
  0x30   :  { %448 = vmatpush.bf16.msrb.mxu0 %v794_v25  ;;  %v1003_v25 = vld [vmem:[#allocation2 + $0x70] sm:$0xff] }
  0x31   :  { %467 = vmatpush.bf16.msrb.mxu1 %v858_v26  ;;  %628 = vmatpush.bf16.msrb.mxu2 %v996_v23  ;;  %v995_v26 = vld [vmem:[#allocation2 + $0x30] sm:$0xff] }
  0x32   :  { %647 = vmatpush.bf16.msrb.mxu3 %v1004_v22 }
  0x34   :  { %449 = vmatpush.bf16.msrb.mxu0 %v786_v31 }
  0x35   :  { %468 = vmatpush.bf16.msrb.mxu1 %v850_v32  ;;  %629 = vmatpush.bf16.msrb.mxu2 %v995_v26 }
  0x36   :  { %648 = vmatpush.bf16.msrb.mxu3 %v1003_v25 }
  0x37   :  { %173 = vmatmul.bf16.gmra.mxu0 %v682_v35 }
  0x38   :  { %192 = vmatmul.bf16.gmra.mxu1 %v682_v35  ;;  %450 = vmatpush.bf16.msrb.mxu0 %v778_v44 }
  0x39   :  { %469 = vmatpush.bf16.msrb.mxu1 %v842_v47  ;;  %630 = vmatpush.bf16.msrb.mxu2 %v994_v30 }
  0x3a   :  { %649 = vmatpush.bf16.msrb.mxu3 %v1002_v29 }
  0x3c   :  { %451 = vmatpush.bf16.msrb.mxu0 %v770_v58  ;;  %v1000_v58 = vld [vmem:[#allocation2 + $0x58] sm:$0xff] }
  0x3d   :  { %470 = vmatpush.bf16.msrb.mxu1 %v834_v59  ;;  %v993_v59 = vld [vmem:[#allocation2 + $0x20] sm:$0xff] }
  0x3e   :  { %650 = vmatpush.bf16.msrb.mxu3 %v1001_v37  ;;  %631 = vmatpush.bf16.msrb.mxu2 %v993_v59 }
  0x40   :  { %452 = vmatpush.bf16.msrb.mxu0 %v762_v4 }
  0x41   :  { %471 = vmatpush.bf16.msrb.mxu1 %v826_v7 }
  0x42   :  { %651 = vmatpush.bf16.msrb.mxu3 %v1000_v58  ;;  %632 = vmatpush.bf16.msrb.mxu2 %v992_v61 }
  0x44   :  { %453 = vmatpush.bf16.msrb.mxu0 %v754_v16 }
  0x45   :  { %472 = vmatpush.bf16.msrb.mxu1 %v818_v19 }
  0x46   :  { %652 = vmatpush.bf16.msrb.mxu3 %v999_v60  ;;  %633 = vmatpush.bf16.msrb.mxu2 %v991_v63 }
  0x4a   :  { %653 = vmatpush.bf16.msrb.mxu3 %v998_v62  ;;  %634 = vmatpush.bf16.msrb.mxu2 %v990_v1 }
  0x4e   :  { %654 = vmatpush.bf16.msrb.mxu3 %v997_v0  ;;  %635 = vmatpush.bf16.msrb.mxu2 %v989_v2 }
  0xa4   :  { %v169_v21 = vpop.f32.mrf.mxu0 }
  0xa5   :  { %v188_v24 = vpop.f32.mrf.mxu1  ;;  %v170_v31 = vadd.f32 %v169_v21, %v64_v27 }
  0xa6   :  { %v189_v32 = vadd.f32 %v188_v24, %v65_v28 }
  0xa7   :  { %v198_v38 = vmax.f32 %v170_v31, 0.0 }
  0xa8   :  { %v199_v40 = vmax.f32 %v189_v32, 0.0 }
  0xac   :  { %v171_v33 = vpop.f32.mrf.mxu0 }
  0xad   :  { %v172_v34 = vadd.f32 %v171_v33, %v64_v27  ;;  %v190_v35 = vpop.f32.mrf.mxu1 }
  0xae   :  { %v191_v36 = vadd.f32 %v190_v35, %v65_v28 }
  0xaf   :  { %v200_v39 = vmax.f32 %v172_v34, 0.0 }
  0xb0   :  { %v201_v41 = vmax.f32 %v191_v36, 0.0 }
  0xb1   :  { %v206_v42 = vpack.c.bf16 %v200_v39, %v198_v38 }
  0xb2   :  { %v207_v43 = vpack.c.bf16 %v201_v41, %v199_v40 }
  0xb3   :  { %416 = vmatmul.bf16.vlgmr.msra.gmra.mxu2 %v206_v42  ;;  %454 = vmatmul.bf16.vlgmr.msrb.gmra.mxu0 %v206_v42 }
  0xb4   :  { %435 = vmatmul.bf16.vlgmr.msra.gmra.mxu3 %v207_v43  ;;  %473 = vmatmul.bf16.vlgmr.msrb.gmra.mxu1 %v207_v43  ;;  %v174_v44 = vpop.f32.mrf.mxu0 }
  0xb5   :  { %v193_v45 = vpop.f32.mrf.mxu1  ;;  %v175_v46 = vadd.f32 %v174_v44, %v64_v27 }
  0xb6   :  { %v194_v47 = vadd.f32 %v193_v45, %v65_v28 }
  0xb7   :  { %v202_v52 = vmax.f32 %v175_v46, 0.0 }
  0xb8   :  { %v203_v54 = vmax.f32 %v194_v47, 0.0 }
  0xbc   :  { %v176_v48 = vpop.f32.mrf.mxu0 }
  0xbd   :  { %v177_v49 = vadd.f32 %v176_v48, %v64_v27  ;;  %v195_v50 = vpop.f32.mrf.mxu1 }
  0xbe   :  { %v196_v51 = vadd.f32 %v195_v50, %v65_v28 }
  0xbf   :  { %v204_v53 = vmax.f32 %v177_v49, 0.0 }
  0xc0   :  { %v205_v55 = vmax.f32 %v196_v51, 0.0  ;;  %v1008_v51 = vld [vmem:[%s1405_s6] ss:$0 sm:$0xff] }
  0xc1   :  { %v208_v56 = vpack.c.bf16 %v204_v53, %v202_v52 }
  0xc2   :  { %v209_v57 = vpack.c.bf16 %v205_v55, %v203_v54 }
  0xc3   :  { %421 = vmatmul.bf16.gmra.mxu2 %v208_v56  ;;  %459 = vmatmul.bf16.gmra.mxu0 %v208_v56 }
  0xc4   :  { %440 = vmatmul.bf16.gmra.mxu3 %v209_v57  ;;  %478 = vmatmul.bf16.gmra.mxu1 %v209_v57 }
 0x130   :  { %v455_v4 = vpop.f32.mrf.mxu0 }
 0x131   :  { %v474_v6 = vpop.f32.mrf.mxu1  ;;  %v456_v7 = vadd.f32 %v455_v4, %v245_v5 }
 0x133   :  { %v475_v12 = vadd.f32 %v474_v6, %v456_v7 }
 0x135   :  { %v485_v17 = vmax.f32 %v475_v12, 0.0 }
 0x136   :  { %v417_v8 = vpop.f32.mrf.mxu2 }
 0x137   :  { %v436_v10 = vpop.f32.mrf.mxu3  ;;  %v418_v15 = vadd.f32 %v417_v8, %v244_v9 }
 0x138   :  { %v457_v11 = vpop.f32.mrf.mxu0 }
 0x139   :  { %v458_v13 = vadd.f32 %v457_v11, %v245_v5  ;;  %v476_v14 = vpop.f32.mrf.mxu1  ;;  %v437_v20 = vadd.f32 %v436_v10, %v418_v15 }
 0x13b   :  { %v477_v16 = vadd.f32 %v476_v14, %v458_v13  ;;  %v484_v27 = vmax.f32 %v437_v20, 0.0 }
 0x13d   :  { %v487_v18 = vmax.f32 %v477_v16, 0.0 }
 0x13e   :  { %v419_v19 = vpop.f32.mrf.mxu2 }
 0x13f   :  { %v493_v21 = vpack.c.bf16 %v487_v18, %v485_v17  ;;  %v420_v22 = vadd.f32 %v419_v19, %v244_v9  ;;  %v438_v23 = vpop.f32.mrf.mxu3 }
 0x140   :  { %v460_v24 = vpop.f32.mrf.mxu0 }
 0x141   :  { %v439_v25 = vadd.f32 %v438_v23, %v420_v22  ;;  %v479_v26 = vpop.f32.mrf.mxu1  ;;  %655 = vmatmul.bf16.vlgmr.msrb.gmra.mxu3 %v493_v21  ;;  %v461_v30 = vadd.f32 %v460_v24, %v245_v5 }
 0x143   :  { %v486_v28 = vmax.f32 %v439_v25, 0.0  ;;  %v480_v34 = vadd.f32 %v479_v26, %v461_v30 }
 0x145   :  { %v492_v29 = vpack.c.bf16 %v486_v28, %v484_v27  ;;  %v489_v39 = vmax.f32 %v480_v34, 0.0 }
 0x146   :  { %v422_v31 = vpop.f32.mrf.mxu2 }
 0x147   :  { %v441_v32 = vpop.f32.mrf.mxu3  ;;  %636 = vmatmul.bf16.vlgmr.msrb.gmra.mxu2 %v492_v29  ;;  %v423_v37 = vadd.f32 %v422_v31, %v244_v9 }
 0x148   :  { %v462_v33 = vpop.f32.mrf.mxu0 }
 0x149   :  { %v463_v35 = vadd.f32 %v462_v33, %v245_v5  ;;  %v481_v36 = vpop.f32.mrf.mxu1  ;;  %v442_v42 = vadd.f32 %v441_v32, %v423_v37 }
 0x14b   :  { %v482_v38 = vadd.f32 %v481_v36, %v463_v35  ;;  %v488_v47 = vmax.f32 %v442_v42, 0.0 }
 0x14d   :  { %v491_v40 = vmax.f32 %v482_v38, 0.0 }
 0x14e   :  { %v424_v41 = vpop.f32.mrf.mxu2 }
 0x14f   :  { %v425_v43 = vadd.f32 %v424_v41, %v244_v9  ;;  %v495_v44 = vpack.c.bf16 %v491_v40, %v489_v39  ;;  %v443_v45 = vpop.f32.mrf.mxu3 }
 0x151   :  { %v444_v46 = vadd.f32 %v443_v45, %v425_v43  ;;  %660 = vmatmul.bf16.gmra.mxu3 %v495_v44 }
 0x153   :  { %v490_v48 = vmax.f32 %v444_v46, 0.0 }
 0x155   :  { %v494_v49 = vpack.c.bf16 %v490_v48, %v488_v47 }
 0x157   :  { %641 = vmatmul.bf16.gmra.mxu2 %v494_v49 }
 0x1c4   :  { %v656_v50 = vpop.f32.mrf.mxu3 }
 0x1ca   :  { %v637_v52 = vpop.f32.mrf.mxu2 }
 0x1cb   :  { %v638_v53 = vadd.f32 %v1008_v51, %v637_v52 }
 0x1cc   :  { %v658_v55 = vpop.f32.mrf.mxu3 }
 0x1cd   :  { %v657_v54 = vadd.f32 %v656_v50, %v638_v53 }
 0x1cf   :  { %666 = vst [vmem:[%s1406_s7] sm:$0xff] %v657_v54 }
 0x1d2   :  { %v639_v56 = vpop.f32.mrf.mxu2 }
 0x1d3   :  { %v640_v57 = vadd.f32 %v1008_v51, %v639_v56 }
 0x1d4   :  { %v661_v59 = vpop.f32.mrf.mxu3 }
 0x1d5   :  { %v659_v58 = vadd.f32 %v658_v55, %v640_v57 }
 0x1d7   :  { %667 = vst [vmem:[%s1406_s7 + $0x8] sm:$0xff] %v659_v58 }
 0x1da   :  { %v642_v60 = vpop.f32.mrf.mxu2 }
 0x1db   :  { %v643_v61 = vadd.f32 %v1008_v51, %v642_v60 }
 0x1dc   :  { %v663_v1 = vpop.f32.mrf.mxu3 }
 0x1dd   :  { %v662_v62 = vadd.f32 %v661_v59, %v643_v61 }
 0x1df   :  { %668 = vst [vmem:[%s1406_s7 + $0x10] sm:$0xff] %v662_v62 }
 0x1e2   :  { %v644_v63 = vpop.f32.mrf.mxu2 }
 0x1e3   :  { %v645_v0 = vadd.f32 %v1008_v51, %v644_v63 }
 0x1e5   :  { %v664_v2 = vadd.f32 %v663_v1, %v645_v0 }
 0x1e7   :  { %669 = vst [vmem:[%s1406_s7 + $0x18] sm:$0x3] %v664_v2 }
 0x1e8   :  { %674 = vsyncpa [#allocation3], 1 }

</bundles_post_ra>
